<compile_context>
chip_gen: v6e
topology: v6e:2x2x1
jax: 0.10.0
libtpu: 0.0.40
codegen_flags: <defaults>
</compile_context>

<pallas_src>
import functools

import jax
import jax.numpy as jnp
from jax import lax
from jax.experimental import pallas as pl
from jax.experimental.pallas import tpu as pltpu


def _relnet_kernel(x_ref, w1_ref, s1_ref, b1_ref,
                   w2_ref, s2_ref, b2_ref,
                   w3_ref, b3_ref, mask_ref,
                   out_ref, *, W):
    """Whole-problem kernel (single invocation), lane-dense layout.

    x_ref    : (9*Cin, L)  im2col'd padded input, L = N*H*W on the lane axis
    w1_ref   : (M, 9*Cin)  conv1 weights, K concatenated over the 9 taps
    s1/b1    : (M, 1)      folded BN1 scale / bias (conv1 bias included)
    w2_ref   : (M, 9*M)    conv2 weights, K concatenated over the 9 taps
    s2/b2    : (M, 1)      folded BN2 scale / bias
    w3_ref   : (M, 1)      1x1 conv3 weights
    b3_ref   : (1, 1)      conv3 bias
    mask_ref : (9*M, L)    per-tap border/image-wrap validity masks (layer 2)
    out_ref  : (1, L)      lane-dense output row
    """
    L = out_ref.shape[1]

    # ---- layer 1: one concatenated-K MXU matmul + folded BN + ReLU ----
    acc1 = jnp.dot(w1_ref[...], x_ref[...], preferred_element_type=jnp.float32)
    out1 = jnp.maximum(acc1 * s1_ref[...] + b1_ref[...], 0.0)        # (M, L)

    # ---- layer 2: 9 shifted windows via XLU rolls + masks, one matmul ----
    pieces = []
    for dy in range(3):
        for dx in range(3):
            s = (dy - 1) * W + (dx - 1)        # flat-index source offset
            if s == 0:
                pieces.append(out1)
            else:
                # want piece[:, f] = out1[:, f + s]  ->  roll by (-s) mod L
                pieces.append(pltpu.roll(out1, shift=(-s) % L, axis=1))
    stacked = jnp.concatenate(pieces, axis=0) * mask_ref[...]        # (9M, L)
    acc2 = jnp.dot(w2_ref[...], stacked, preferred_element_type=jnp.float32)
    out2 = jnp.maximum(acc2 * s2_ref[...] + b2_ref[...], 0.0)        # (M, L)

    # ---- layer 3: 1x1 conv to a single channel (sublane reduction) ----
    out_ref[...] = (jnp.sum(out2 * w3_ref[...], axis=0, keepdims=True)
                    + b3_ref[...])


@jax.jit
def relation_net_patch_v1(x_nchw, params):
    """Forward pass matching RelationNetPatch_v1 (eval-mode BatchNorm).

    x_nchw: (N, 2*C0, H, W) float32 (PyTorch NCHW convention).
    Returns (N, 1, H, W) float32.
    """
    (w1, s1, b1, w2, s2, b2, w3, b3) = params
    N, Cin, H, W = x_nchw.shape
    M = w1.shape[3]
    L = N * H * W

    # --- wrapper-side im2col for layer 1 (spatial on the lane axis) ---
    x_nhwc = jnp.transpose(x_nchw, (0, 2, 3, 1))
    xpad = jnp.pad(x_nhwc, ((0, 0), (1, 1), (1, 1), (0, 0)))
    cols = []
    for dy in range(3):
        for dx in range(3):
            p = xpad[:, dy:dy + H, dx:dx + W, :]                  # (N,H,W,Cin)
            cols.append(jnp.transpose(p, (3, 0, 1, 2)).reshape(Cin, L))
    x_im2col = jnp.concatenate(cols, axis=0)                      # (9*Cin, L)

    # --- weight reshapes: (M, 9*K) with columns ordered (tap, in-channel) ---
    w1r = jnp.transpose(w1, (3, 0, 1, 2)).reshape(M, 9 * Cin)
    w2r = jnp.transpose(w2, (3, 0, 1, 2)).reshape(M, 9 * M)

    # --- layer-2 per-tap destination-validity masks (border + image wrap) ---
    f = jnp.arange(L, dtype=jnp.int32)
    xx = f % W
    yy = (f // W) % H
    mrows = []
    for dy in range(3):
        for dx in range(3):
            ey, ex = dy - 1, dx - 1
            valid = ((yy + ey >= 0) & (yy + ey < H) &
                     (xx + ex >= 0) & (xx + ex < W)).astype(jnp.float32)
            mrows.append(jnp.tile(valid[None, :], (M, 1)))
    mask2 = jnp.concatenate(mrows, axis=0)                        # (9*M, L)

    s1c, b1c = s1.reshape(M, 1), b1.reshape(M, 1)
    s2c, b2c = s2.reshape(M, 1), b2.reshape(M, 1)
    w3c, b3c = w3.reshape(M, 1), b3.reshape(1, 1)

    kernel = functools.partial(_relnet_kernel, W=W)
    vmem_spec = pl.BlockSpec(memory_space=pltpu.MemorySpace.VMEM)
    out_flat = pl.pallas_call(
        kernel,
        out_shape=jax.ShapeDtypeStruct((1, L), jnp.float32),
        in_specs=[vmem_spec] * 10,
        out_specs=vmem_spec,
    )(x_im2col, w1r, s1c, b1c, w2r, s2c, b2c, w3c, b3c, mask2)

    return out_flat.reshape(N, 1, H, W)


def make_params(key, cin, mid):
    """Deterministic synthetic parameters. BN (eval mode) folded into scale/bias."""
    ks = jax.random.split(key, 8)
    eps = 1e-5

    # layer 1: conv(3,3,cin,mid) + BN(mid)
    w1 = jax.random.normal(ks[0], (3, 3, cin, mid), jnp.float32) * 0.1
    bc1 = jax.random.normal(ks[1], (mid,), jnp.float32) * 0.05
    gamma1 = 1.0 + 0.1 * jnp.cos(jnp.arange(mid, dtype=jnp.float32))
    beta1 = 0.05 * jnp.sin(jnp.arange(mid, dtype=jnp.float32))
    mean1 = 0.01 * jnp.arange(mid, dtype=jnp.float32)
    var1 = 1.0 + 0.02 * jnp.arange(mid, dtype=jnp.float32)
    s1 = gamma1 / jnp.sqrt(var1 + eps)
    b1 = (bc1 - mean1) * s1 + beta1

    # layer 2: conv(3,3,mid,mid) + BN(mid)
    w2 = jax.random.normal(ks[2], (3, 3, mid, mid), jnp.float32) * 0.1
    bc2 = jax.random.normal(ks[3], (mid,), jnp.float32) * 0.05
    gamma2 = 1.0 + 0.1 * jnp.sin(jnp.arange(mid, dtype=jnp.float32))
    beta2 = 0.05 * jnp.cos(jnp.arange(mid, dtype=jnp.float32))
    mean2 = -0.01 * jnp.arange(mid, dtype=jnp.float32)
    var2 = 1.0 + 0.03 * jnp.arange(mid, dtype=jnp.float32)
    s2 = gamma2 / jnp.sqrt(var2 + eps)
    b2 = (bc2 - mean2) * s2 + beta2

    # layer 3: 1x1 conv mid -> 1
    w3 = jax.random.normal(ks[4], (mid, 1), jnp.float32) * 0.1
    b3 = jax.random.normal(ks[5], (1, 1), jnp.float32) * 0.05

    return (w1, s1, b1, w2, s2, b2, w3, b3)


def reference_forward(x_nchw, params):
    """Pure-JAX reference (lax.conv) for correctness check."""
    (w1, s1, b1, w2, s2, b2, w3, b3) = params
    dn = ("NHWC", "HWIO", "NHWC")
    x = jnp.transpose(x_nchw, (0, 2, 3, 1))
    y = lax.conv_general_dilated(x, w1, (1, 1), "SAME", dimension_numbers=dn)
    y = jnp.maximum(y * s1.reshape(1, 1, 1, -1) + b1.reshape(1, 1, 1, -1), 0.0)
    y = lax.conv_general_dilated(y, w2, (1, 1), "SAME", dimension_numbers=dn)
    y = jnp.maximum(y * s2.reshape(1, 1, 1, -1) + b2.reshape(1, 1, 1, -1), 0.0)
    y = lax.conv_general_dilated(y, w3.reshape(1, 1, -1, 1), (1, 1), "SAME",
                                 dimension_numbers=dn) + b3.reshape(1, 1, 1, 1)
    return jnp.transpose(y, (0, 3, 1, 2))


if __name__ == "__main__":
    # Small shapes consistent with the module: input_size=[C0, H, W] with
    # conv1 taking 2*C0 channels; here C0=4, middle_dim=8, H=W=16, batch=2.
    N, C0, H, W = 2, 4, 16, 16
    Cin, MID = 2 * C0, 8

    key = jax.random.PRNGKey(0)
    kx, kp = jax.random.split(key)
    x = jax.random.normal(kx, (N, Cin, H, W), jnp.float32)
    params = make_params(kp, Cin, MID)

    out = relation_net_patch_v1(x, params)
    out = jax.block_until_ready(out)

    ref = jax.block_until_ready(reference_forward(x, params))
    assert out.shape == (N, 1, H, W)
    assert jnp.allclose(out, ref, atol=1e-3, rtol=1e-3), "mismatch vs reference"

    print("KERNEL_OK")
</pallas_src>

<mosaic_0001>
module attributes {stable_mosaic.version = 11 : i64} {
  func.func @_relnet_kernel(%arg0: memref<72x512xf32, #tpu.memory_space<vmem>>, %arg1: memref<8x72xf32, #tpu.memory_space<vmem>>, %arg2: memref<8x1xf32, #tpu.memory_space<vmem>>, %arg3: memref<8x1xf32, #tpu.memory_space<vmem>>, %arg4: memref<8x72xf32, #tpu.memory_space<vmem>>, %arg5: memref<8x1xf32, #tpu.memory_space<vmem>>, %arg6: memref<8x1xf32, #tpu.memory_space<vmem>>, %arg7: memref<8x1xf32, #tpu.memory_space<vmem>>, %arg8: memref<1x1xf32, #tpu.memory_space<vmem>>, %arg9: memref<72x512xf32, #tpu.memory_space<vmem>>, %arg10: memref<1x512xf32, #tpu.memory_space<vmem>>) attributes {dimension_semantics = [], scalar_prefetch = 0 : i64, scratch_operands = 0 : i64, tpu.core_type = #tpu.core_type<tc>} {
    %c0 = arith.constant 0 : index
    %c0_0 = arith.constant 0 : index
    %0 = vector.load %arg1[%c0, %c0_0] : memref<8x72xf32, #tpu.memory_space<vmem>>, vector<8x72xf32>
    %c0_1 = arith.constant 0 : index
    %c0_2 = arith.constant 0 : index
    %1 = vector.load %arg0[%c0_1, %c0_2] : memref<72x512xf32, #tpu.memory_space<vmem>>, vector<72x512xf32>
    %cst = arith.constant dense<0.000000e+00> : vector<8x512xf32>
    %2 = tpu.matmul %0, %1, %cst {dimension_numbers = #tpu.dot_dimension_numbers<[1], [0], [0], [1], [0, 0, 1, 1], [], []>} : vector<8x72xf32>, vector<72x512xf32>, vector<8x512xf32> -> vector<8x512xf32>
    %c0_3 = arith.constant 0 : index
    %c0_4 = arith.constant 0 : index
    %3 = vector.load %arg2[%c0_3, %c0_4] : memref<8x1xf32, #tpu.memory_space<vmem>>, vector<8x1xf32>
    %4 = vector.broadcast %3 : vector<8x1xf32> to vector<8x512xf32>
    %5 = arith.mulf %2, %4 : vector<8x512xf32>
    %c0_5 = arith.constant 0 : index
    %c0_6 = arith.constant 0 : index
    %6 = vector.load %arg3[%c0_5, %c0_6] : memref<8x1xf32, #tpu.memory_space<vmem>>, vector<8x1xf32>
    %7 = vector.broadcast %6 : vector<8x1xf32> to vector<8x512xf32>
    %8 = arith.addf %5, %7 : vector<8x512xf32>
    %cst_7 = arith.constant 0.000000e+00 : f32
    %9 = vector.broadcast %cst_7 : f32 to vector<8x512xf32>
    %10 = arith.maximumf %8, %9 : vector<8x512xf32>
    %c17_i32 = arith.constant 17 : i32
    %11 = tpu.dynamic_rotate %10 by %c17_i32 dim 1 : vector<8x512xf32>, i32 -> vector<8x512xf32>
    %c16_i32 = arith.constant 16 : i32
    %12 = tpu.dynamic_rotate %10 by %c16_i32 dim 1 : vector<8x512xf32>, i32 -> vector<8x512xf32>
    %c15_i32 = arith.constant 15 : i32
    %13 = tpu.dynamic_rotate %10 by %c15_i32 dim 1 : vector<8x512xf32>, i32 -> vector<8x512xf32>
    %c1_i32 = arith.constant 1 : i32
    %14 = tpu.dynamic_rotate %10 by %c1_i32 dim 1 : vector<8x512xf32>, i32 -> vector<8x512xf32>
    %c511_i32 = arith.constant 511 : i32
    %15 = tpu.dynamic_rotate %10 by %c511_i32 dim 1 : vector<8x512xf32>, i32 -> vector<8x512xf32>
    %c497_i32 = arith.constant 497 : i32
    %16 = tpu.dynamic_rotate %10 by %c497_i32 dim 1 : vector<8x512xf32>, i32 -> vector<8x512xf32>
    %c496_i32 = arith.constant 496 : i32
    %17 = tpu.dynamic_rotate %10 by %c496_i32 dim 1 : vector<8x512xf32>, i32 -> vector<8x512xf32>
    %c495_i32 = arith.constant 495 : i32
    %18 = tpu.dynamic_rotate %10 by %c495_i32 dim 1 : vector<8x512xf32>, i32 -> vector<8x512xf32>
    %19 = tpu.concatenate %11, %12, %13, %14, %10, %15, %16, %17, %18 in 0 : vector<8x512xf32>, vector<8x512xf32>, vector<8x512xf32>, vector<8x512xf32>, vector<8x512xf32>, vector<8x512xf32>, vector<8x512xf32>, vector<8x512xf32>, vector<8x512xf32> -> vector<72x512xf32>
    %c0_8 = arith.constant 0 : index
    %c0_9 = arith.constant 0 : index
    %20 = vector.load %arg9[%c0_8, %c0_9] : memref<72x512xf32, #tpu.memory_space<vmem>>, vector<72x512xf32>
    %21 = arith.mulf %19, %20 : vector<72x512xf32>
    %c0_10 = arith.constant 0 : index
    %c0_11 = arith.constant 0 : index
    %22 = vector.load %arg4[%c0_10, %c0_11] : memref<8x72xf32, #tpu.memory_space<vmem>>, vector<8x72xf32>
    %cst_12 = arith.constant dense<0.000000e+00> : vector<8x512xf32>
    %23 = tpu.matmul %22, %21, %cst_12 {dimension_numbers = #tpu.dot_dimension_numbers<[1], [0], [0], [1], [0, 0, 1, 1], [], []>} : vector<8x72xf32>, vector<72x512xf32>, vector<8x512xf32> -> vector<8x512xf32>
    %c0_13 = arith.constant 0 : index
    %c0_14 = arith.constant 0 : index
    %24 = vector.load %arg5[%c0_13, %c0_14] : memref<8x1xf32, #tpu.memory_space<vmem>>, vector<8x1xf32>
    %25 = vector.broadcast %24 : vector<8x1xf32> to vector<8x512xf32>
    %26 = arith.mulf %23, %25 : vector<8x512xf32>
    %c0_15 = arith.constant 0 : index
    %c0_16 = arith.constant 0 : index
    %27 = vector.load %arg6[%c0_15, %c0_16] : memref<8x1xf32, #tpu.memory_space<vmem>>, vector<8x1xf32>
    %28 = vector.broadcast %27 : vector<8x1xf32> to vector<8x512xf32>
    %29 = arith.addf %26, %28 : vector<8x512xf32>
    %cst_17 = arith.constant 0.000000e+00 : f32
    %30 = vector.broadcast %cst_17 : f32 to vector<8x512xf32>
    %31 = arith.maximumf %29, %30 : vector<8x512xf32>
    %c0_18 = arith.constant 0 : index
    %c0_19 = arith.constant 0 : index
    %32 = vector.load %arg7[%c0_18, %c0_19] : memref<8x1xf32, #tpu.memory_space<vmem>>, vector<8x1xf32>
    %33 = vector.broadcast %32 : vector<8x1xf32> to vector<8x512xf32>
    %34 = arith.mulf %31, %33 : vector<8x512xf32>
    %cst_20 = arith.constant dense<0.000000e+00> : vector<512xf32>
    %35 = vector.multi_reduction <add>, %34, %cst_20 [0] : vector<8x512xf32> to vector<512xf32>
    %36 = vector.shape_cast %35 : vector<512xf32> to vector<1x512xf32>
    %c0_21 = arith.constant 0 : index
    %c0_22 = arith.constant 0 : index
    %37 = vector.load %arg8[%c0_21, %c0_22] : memref<1x1xf32, #tpu.memory_space<vmem>>, vector<1x1xf32>
    %38 = vector.broadcast %37 : vector<1x1xf32> to vector<1x512xf32>
    %39 = arith.addf %36, %38 : vector<1x512xf32>
    %c0_23 = arith.constant 0 : index
    %c0_24 = arith.constant 0 : index
    %40 = vector.load %arg10[%c0_23, %c0_24] : memref<1x512xf32, #tpu.memory_space<vmem>>, vector<1x512xf32>
    tpu.vector_store %arg10[%c0_23, %c0_24], %39 {strides = array<i32>} : memref<1x512xf32, #tpu.memory_space<vmem>>, vector<1x512xf32>,
    return
  }
}

</mosaic_0001>

<bundles_post_ra>
// kernel: relation_net_patch_v1.1
= control target key start
LH: loop header
LB: loop body
LE: loop exit
PB: predicated region body
PF: predicated region fallthrough
CT: control target
= control target key end

     0   :  { %v695_v3 = vmov 0.0   ;;  %vm74_vm0 = vcmask 588800   ;;  %v696_v39 = vmov 0   ;;  %s699_s29 = smov 113   ;;  %s700_s30 = smov 127   ;;  %s1125_s0 = inlined_call_operand.vmem [shape: f32[72,512], index: 0, kind: input, shape index: {}]   ;;  %s1126_s1 = inlined_call_operand.vmem [shape: f32[8,72], index: 1, kind: input, shape index: {}]   ;;  %s1127_s2 = inlined_call_operand.vmem [shape: f32[8,1], index: 2, kind: input, shape index: {}]   ;;  %s1128_s3 = inlined_call_operand.vmem [shape: f32[8,1], index: 3, kind: input, shape index: {}]   ;;  %s1129_s5 = inlined_call_operand.vmem [shape: f32[8,1], index: 5, kind: input, shape index: {}]   ;;  %s1130_s7 = inlined_call_operand.vmem [shape: f32[8,1], index: 7, kind: input, shape index: {}]   ;;  %s1131_s8 = inlined_call_operand.<no memory space> [shape: f32[1,1], index: 8, kind: input, shape index: {}]   ;;  %s1132_s6 = inlined_call_operand.vmem [shape: f32[8,1], index: 6, kind: input, shape index: {}]   ;;  %s1133_s9 = inlined_call_operand.vmem [shape: f32[72,512], index: 9, kind: input, shape index: {}]   ;;  %s1134_s4 = inlined_call_operand.vmem [shape: f32[8,72], index: 4, kind: input, shape index: {}]   ;;  %s1135_s10 = inlined_call_operand.vmem [shape: f32[1,512], index: 10, kind: output, shape index: {}]  }
   0x1   :  { %v71_v0 = vld [vmem:[%s1125_s0 + $0x108] sm:$0xff]  ;;  %v73_v1 = vld [vmem:[%s1125_s0 + $0x118] sm:$0xff]  ;;  %v70_v2 = vld [vmem:[%s1125_s0 + $0x100] sm:$0xff]  ;;  %142 = vmatprep.mubr.f32.mxu0 %v695_v3  ;;  %213 = vmatprep.mubr.f32.mxu1 %v695_v3  ;;  %s701_s11 = smov 1   ;;  %s702_s12 = smov 15   ;;  %v15_v60 = vstv %s1131_s8 }
   0x2   :  { %92 = vmatprep.subr.mxu0 %v71_v0  ;;  %163 = vmatprep.subr.mxu1 %v73_v1  ;;  %v72_v4 = vld [vmem:[%s1125_s0 + $0x110] sm:$0xff]  ;;  %v67_v5 = vld [vmem:[%s1125_s0 + $0xe8] sm:$0xff]  ;;  %v69_v6 = vld [vmem:[%s1125_s0 + $0xf8] sm:$0xff]  ;;  %s703_s13 = smov 16   ;;  %s704_s14 = smov 17   ;;  %v252_v0 = vlaneseq }
   0x3   :  { %93 = vmatpush1.msra.mxu0 %v70_v2  ;;  %164 = vmatpush1.msra.mxu1 %v72_v4  ;;  %v66_v7 = vld [vmem:[%s1125_s0 + $0xe0] sm:$0xff]  ;;  %v68_v8 = vld [vmem:[%s1125_s0 + $0xf0] sm:$0xff]  ;;  %v63_v9 = vld [vmem:[%s1125_s0 + $0xc8] sm:$0xff]  ;;  %16 = vst [vmem:[#allocation2] sm:$0x1] %v15_v60 }
   0x4   :  { %94 = vmatprep.subr.mxu0 %v67_v5  ;;  %165 = vmatprep.subr.mxu1 %v69_v6  ;;  %v65_v10 = vld [vmem:[%s1125_s0 + $0xd8] sm:$0xff]  ;;  %v62_v11 = vld [vmem:[%s1125_s0 + $0xc0] sm:$0xff]  ;;  %v64_v12 = vld [vmem:[%s1125_s0 + $0xd0] sm:$0xff]  ;;  %v937_v1 = vand.u32 127, %v252_v0  ;;  %vm671_vm9 = vcmp.lt.s32.totalorder %v252_v0, 512 }
   0x5   :  { %95 = vmatpush1.msra.mxu0 %v66_v7  ;;  %166 = vmatpush1.msra.mxu1 %v68_v8  ;;  %v59_v13 = vld [vmem:[%s1125_s0 + $0xa8] sm:$0xff]  ;;  %v61_v14 = vld [vmem:[%s1125_s0 + $0xb8] sm:$0xff]  ;;  %v58_v15 = vld [vmem:[%s1125_s0 + $0xa0] sm:$0xff] }
   0x6   :  { %96 = vmatprep.subr.mxu0 %v63_v9  ;;  %167 = vmatprep.subr.mxu1 %v65_v10  ;;  %v60_v16 = vld [vmem:[%s1125_s0 + $0xb0] sm:$0xff]  ;;  %v55_v17 = vld [vmem:[%s1125_s0 + $0x88] sm:$0xff]  ;;  %v57_v18 = vld [vmem:[%s1125_s0 + $0x98] sm:$0xff]  ;;  %vm345_vm1 = vcmp.lt.s32.totalorder %v937_v1, 111  ;;  %vm332_vm2 = vcmp.lt.s32.totalorder %v937_v1, 112  ;;  %vm319_vm3 = vcmp.lt.s32.totalorder %v937_v1, 113 }
   0x7   :  { %97 = vmatpush1.msra.mxu0 %v62_v11  ;;  %168 = vmatpush1.msra.mxu1 %v64_v12  ;;  %v54_v19 = vld [vmem:[%s1125_s0 + $0x80] sm:$0xff]  ;;  %v56_v20 = vld [vmem:[%s1125_s0 + $0x90] sm:$0xff]  ;;  %v51_v21 = vld [vmem:[%s1125_s0 + $0x68] sm:$0xff]  ;;  %vm306_vm4 = vcmp.lt.s32.totalorder %v937_v1, 127  ;;  %vm293_vm5 = vcmp.lt.s32.totalorder %v937_v1, 1  ;;  %vm280_vm6 = vcmp.lt.s32.totalorder %v937_v1, 15 }
   0x8   :  { %98 = vmatprep.subr.mxu0 %v59_v13  ;;  %169 = vmatprep.subr.mxu1 %v61_v14  ;;  %v53_v22 = vld [vmem:[%s1125_s0 + $0x78] sm:$0xff]  ;;  %v50_v23 = vld [vmem:[%s1125_s0 + $0x60] sm:$0xff]  ;;  %v52_v24 = vld [vmem:[%s1125_s0 + $0x70] sm:$0xff]  ;;  %vm267_vm7 = vcmp.lt.s32.totalorder %v937_v1, 16  ;;  %vm254_vm8 = vcmp.lt.s32.totalorder %v937_v1, 17 }
   0x9   :  { %99 = vmatpush1.msra.mxu0 %v58_v15  ;;  %170 = vmatpush1.msra.mxu1 %v60_v16  ;;  %v47_v25 = vld [vmem:[%s1125_s0 + $0x48] sm:$0xff]  ;;  %v49_v26 = vld [vmem:[%s1125_s0 + $0x58] sm:$0xff]  ;;  %v46_v27 = vld [vmem:[%s1125_s0 + $0x40] sm:$0xff] }
   0xa   :  { %100 = vmatprep.subr.mxu0 %v55_v17  ;;  %171 = vmatprep.subr.mxu1 %v57_v18  ;;  %v48_v28 = vld [vmem:[%s1125_s0 + $0x50] sm:$0xff]  ;;  %v43_v29 = vld [vmem:[%s1125_s0 + $0x28] sm:$0xff]  ;;  %v45_v30 = vld [vmem:[%s1125_s0 + $0x38] sm:$0xff] }
   0xb   :  { %101 = vmatpush1.msra.mxu0 %v54_v19  ;;  %172 = vmatpush1.msra.mxu1 %v56_v20  ;;  %v42_v31 = vld [vmem:[%s1125_s0 + $0x20] sm:$0xff]  ;;  %v44_v32 = vld [vmem:[%s1125_s0 + $0x30] sm:$0xff]  ;;  %v39_v33 = vld [vmem:[%s1125_s0 + $0x8] sm:$0xff] }
   0xc   :  { %102 = vmatprep.subr.mxu0 %v51_v21  ;;  %173 = vmatprep.subr.mxu1 %v53_v22  ;;  %v41_v34 = vld [vmem:[%s1125_s0 + $0x18] sm:$0xff]  ;;  %v38_v35 = vld [vmem:[%s1125_s0] sm:$0xff]  ;;  %v40_v36 = vld [vmem:[%s1125_s0 + $0x10] sm:$0xff] }
   0xd   :  { %103 = vmatpush1.msra.mxu0 %v50_v23  ;;  %174 = vmatpush1.msra.mxu1 %v52_v24  ;;  %v37_v37 = vld [vmem:[%s1126_s1] sm:$0xff]  ;;  %v383_v5 = vld [vmem:[%s1133_s9 + $0x108] sm:$0xff]  ;;  %v384_v12 = vld [vmem:[%s1133_s9 + $0x110] sm:$0xff] }
   0xe   :  { %104 = vmatprep.subr.mxu0 %v47_v25  ;;  %175 = vmatprep.subr.mxu1 %v49_v26  ;;  %v220_v38 = vld [vmem:[%s1127_s2] sm:$0xff]  ;;  %s697_s2 = smov 111   ;;  %v385_v13 = vld [vmem:[%s1133_s9 + $0x118] sm:$0xff]  ;;  %v379_v21 = vld [vmem:[%s1133_s9 + $0xe8] sm:$0xff] }
   0xf   :  { %105 = vmatpush1.msra.mxu0 %v46_v27  ;;  %176 = vmatpush1.msra.mxu1 %v48_v28  ;;  %v230_v40 = vld [vmem:[%s1128_s3] sm:$0xff]  ;;  %s698_s3 = smov 112   ;;  %v380_v28 = vld [vmem:[%s1133_s9 + $0xf0] sm:$0xff] }
  0x10   :  { %106 = vmatprep.subr.mxu0 %v43_v29  ;;  %177 = vmatprep.subr.mxu1 %v45_v30  ;;  %v568_v59 = vld [vmem:[%s1129_s5] sm:$0xff]  ;;  %v381_v29 = vld [vmem:[%s1133_s9 + $0xf8] sm:$0xff] }
  0x11   :  { %107 = vmatpush1.msra.mxu0 %v42_v31  ;;  %178 = vmatpush1.msra.mxu1 %v44_v32  ;;  %v592_v61 = vld [vmem:[%s1130_s7] sm:$0xff] }
  0x12   :  { %108 = vmatprep.subr.mxu0 %v39_v33  ;;  %179 = vmatprep.subr.mxu1 %v41_v34  ;;  %v578_v62 = vld [vmem:[%s1132_s6] sm:$0xff] }
  0x13   :  { %109 = vmatpush1.msra.mxu0 %v38_v35  ;;  %180 = vmatpush1.msra.mxu1 %v40_v36  ;;  %v626_v63 = vld [vmem:[#allocation2] sm:$0x1] }
  0x14   :  { %678 = vmatmul.mubr.msk.f32.vlgmr.msra.gmra.mxu0 %vm74_vm0, %v37_v37  ;;  %679 = vmatmul.mubr.msk.f32.vlgmr.msra.gmra.mxu1 %vm74_vm0, %v37_v37  ;;  %v382_v4 = vld [vmem:[%s1133_s9 + $0x100] sm:$0xff]  ;;  %v375_v37 = vld [vmem:[%s1133_s9 + $0xc8] sm:$0xff] }
  0x15   :  { %693 = vset.pattern.permute.xlu0 %v696_v39  ;;  %490 = vmatprep.mubr.f32.mxu0 %v695_v3  ;;  %v378_v20 = vld [vmem:[%s1133_s9 + $0xe0] sm:$0xff] }
  0x16   :  { %223 = vperm.xlu0 %693, %v220_v38   ;;  %561 = vmatprep.mubr.f32.mxu1 %v695_v3  ;;  %v374_v36 = vld [vmem:[%s1133_s9 + $0xc0] sm:$0xff] }
  0x17   :  { %694 = vset.pattern.permute.xlu1 %v696_v39 }
  0x1a   :  { %233 = vperm.xlu0 %693, %v230_v40  }
  0x91   :  { %v224_v41 = vpop.permute.xlu0 %223 }
  0x95   :  { %v234_v44 = vpop.permute.xlu0 %233 }
  0xd4   :  { %v144_v42 = vpop.f32.mrf.mxu0  ;;  %v215_v43 = vpop.f32.mrf.mxu1 }
  0xd5   :  { %v226_v45 = vmul.f32 %v224_v41, %v144_v42  ;;  %v228_v46 = vmul.f32 %v224_v41, %v215_v43 }
  0xd6   :  { %v146_v47 = vpop.f32.mrf.mxu0  ;;  %v217_v48 = vpop.f32.mrf.mxu1 }
  0xd7   :  { %v236_v49 = vadd.f32 %v234_v44, %v226_v45  ;;  %v238_v50 = vadd.f32 %v234_v44, %v228_v46  ;;  %v227_v51 = vmul.f32 %v224_v41, %v146_v47  ;;  %v229_v55 = vmul.f32 %v224_v41, %v217_v48  ;;  %v377_v45 = vld [vmem:[%s1133_s9 + $0xd8] sm:$0xff] }
  0xd9   :  { %v884_v52 = vmax.f32 %v236_v49, 0.0  ;;  %v886_v53 = vmax.f32 %v238_v50, 0.0  ;;  %v237_v54 = vadd.f32 %v234_v44, %v227_v51  ;;  %v239_v57 = vadd.f32 %v234_v44, %v229_v55  ;;  %v376_v44 = vld [vmem:[%s1133_s9 + $0xd0] sm:$0xff]  ;;  %v371_v55 = vld [vmem:[%s1133_s9 + $0xa8] sm:$0xff] }
  0xdb   :  { %341 = vrot.lane.b32.xlu0 %v886_v53, %s697_s2  ;;  %337 = vrot.lane.b32.xlu1 %v884_v52, %s697_s2  ;;  %v890_v56 = vmax.f32 %v237_v54, 0.0  ;;  %v894_v58 = vmax.f32 %v239_v57, 0.0  ;;  %v370_v54 = vld [vmem:[%s1133_s9 + $0xa0] sm:$0xff] }
  0xdf   :  { %324 = vrot.lane.b32.xlu0 %v884_v52, %s698_s3  ;;  %339 = vrot.lane.b32.xlu1 %v890_v56, %s697_s2 }
  0xe3   :  { %328 = vrot.lane.b32.xlu0 %v886_v53, %s698_s3  ;;  %343 = vrot.lane.b32.xlu1 %v894_v58, %s697_s2 }
  0xe7   :  { %311 = vrot.lane.b32.xlu0 %v884_v52, %s699_s29  ;;  %326 = vrot.lane.b32.xlu1 %v890_v56, %s698_s3 }
  0xeb   :  { %315 = vrot.lane.b32.xlu0 %v886_v53, %s699_s29  ;;  %330 = vrot.lane.b32.xlu1 %v894_v58, %s698_s3 }
  0xef   :  { %298 = vrot.lane.b32.xlu0 %v884_v52, %s700_s30  ;;  %313 = vrot.lane.b32.xlu1 %v890_v56, %s699_s29 }
  0xf3   :  { %302 = vrot.lane.b32.xlu0 %v886_v53, %s700_s30  ;;  %317 = vrot.lane.b32.xlu1 %v894_v58, %s699_s29 }
  0xf7   :  { %285 = vrot.lane.b32.xlu0 %v884_v52, %s701_s11  ;;  %300 = vrot.lane.b32.xlu1 %v890_v56, %s700_s30 }
  0xfb   :  { %289 = vrot.lane.b32.xlu0 %v886_v53, %s701_s11  ;;  %304 = vrot.lane.b32.xlu1 %v894_v58, %s700_s30 }
  0xff   :  { %272 = vrot.lane.b32.xlu0 %v884_v52, %s702_s12  ;;  %287 = vrot.lane.b32.xlu1 %v890_v56, %s701_s11 }
 0x103   :  { %276 = vrot.lane.b32.xlu0 %v886_v53, %s702_s12  ;;  %291 = vrot.lane.b32.xlu1 %v894_v58, %s701_s11 }
 0x107   :  { %259 = vrot.lane.b32.xlu0 %v884_v52, %s703_s13  ;;  %274 = vrot.lane.b32.xlu1 %v890_v56, %s702_s12 }
 0x10b   :  { %263 = vrot.lane.b32.xlu0 %v886_v53, %s703_s13  ;;  %278 = vrot.lane.b32.xlu1 %v894_v58, %s702_s12 }
 0x10f   :  { %244 = vrot.lane.b32.xlu0 %v884_v52, %s704_s14  ;;  %261 = vrot.lane.b32.xlu1 %v890_v56, %s703_s13 }
 0x113   :  { %248 = vrot.lane.b32.xlu0 %v886_v53, %s704_s14  ;;  %265 = vrot.lane.b32.xlu1 %v894_v58, %s703_s13 }
 0x117   :  { %571 = vperm.xlu0 %693, %v568_v59   ;;  %246 = vrot.lane.b32.xlu1 %v890_v56, %s704_s14 }
 0x11b   :  { %595 = vperm.xlu0 %693, %v592_v61   ;;  %250 = vrot.lane.b32.xlu1 %v894_v58, %s704_s14 }
 0x11f   :  { %581 = vperm.xlu1 %694, %v578_v62   ;;  %v367_v62 = vld [vmem:[%s1133_s9 + $0x88] sm:$0xff] }
 0x123   :  { %629 = vperm.xlu1 %694, %v626_v63  }
 0x14d   :  { %v342_v2 = vpop.permute.xlu0 %341  ;;  %v338_v3 = vpop.permute.xlu1 %337 }
 0x151   :  { %v325_v6 = vpop.permute.xlu0 %324  ;;  %v340_v7 = vpop.permute.xlu1 %339 }
 0x152   :  { %v347_v8 = vsel %vm345_vm1, %v340_v7, %v342_v2  ;;  %v348_v9 = vsel %vm345_vm1, %v338_v3, %v340_v7 }
 0x153   :  { %v418_v10 = vmul.f32 %v382_v4, %v348_v9  ;;  %v419_v11 = vmul.f32 %v383_v5, %v347_v8  ;;  %v372_v4 = vld [vmem:[%s1133_s9 + $0xb0] sm:$0xff]  ;;  %v373_v5 = vld [vmem:[%s1133_s9 + $0xb8] sm:$0xff]  ;;  %v403_v8 = vmul.f32 %v367_v62, %v890_v56 }
 0x154   :  { %v368_v56 = vld [vmem:[%s1133_s9 + $0x90] sm:$0xff] }
 0x155   :  { %v329_v14 = vpop.permute.xlu0 %328  ;;  %440 = vmatprep.subr.mxu0 %v419_v11  ;;  %v344_v15 = vpop.permute.xlu1 %343 }
 0x156   :  { %v346_v16 = vsel %vm345_vm1, %v342_v2, %v344_v15  ;;  %v349_v17 = vsel %vm345_vm1, %v344_v15, %v338_v3  ;;  %441 = vmatpush1.msra.mxu0 %v418_v10  ;;  %v366_v3 = vld [vmem:[%s1133_s9 + $0x80] sm:$0xff]  ;;  %v363_v15 = vld [vmem:[%s1133_s9 + $0x68] sm:$0xff] }
 0x157   :  { %v420_v18 = vmul.f32 %v384_v12, %v346_v16  ;;  %v421_v19 = vmul.f32 %v385_v13, %v349_v17  ;;  %v402_v11 = vmul.f32 %v366_v3, %v884_v52  ;;  %v369_v12 = vld [vmem:[%s1133_s9 + $0x98] sm:$0xff]  ;;  %v351_v3 = vld [vmem:[%s1133_s9 + $0x8] sm:$0xff] }
 0x158   :  { %v405_v17 = vmul.f32 %v369_v12, %v894_v58  ;;  %v364_v58 = vld [vmem:[%s1133_s9 + $0x70] sm:$0xff] }
 0x159   :  { %v312_v22 = vpop.permute.xlu0 %311  ;;  %511 = vmatprep.subr.mxu1 %v421_v19  ;;  %v327_v23 = vpop.permute.xlu1 %326  ;;  %v404_v19 = vmul.f32 %v368_v56, %v886_v53 }
 0x15a   :  { %v334_v24 = vsel %vm332_vm2, %v327_v23, %v329_v14  ;;  %v335_v25 = vsel %vm332_vm2, %v325_v6, %v327_v23  ;;  %512 = vmatpush1.msra.mxu1 %v420_v18 }
 0x15b   :  { %v414_v26 = vmul.f32 %v378_v20, %v335_v25  ;;  %v415_v27 = vmul.f32 %v379_v21, %v334_v24  ;;  %v362_v21 = vld [vmem:[%s1133_s9 + $0x60] sm:$0xff] }
 0x15d   :  { %v316_v30 = vpop.permute.xlu0 %315  ;;  %442 = vmatprep.subr.mxu0 %v415_v27  ;;  %v331_v31 = vpop.permute.xlu1 %330 }
 0x15e   :  { %v333_v32 = vsel %vm332_vm2, %v329_v14, %v331_v31  ;;  %v336_v33 = vsel %vm332_vm2, %v331_v31, %v325_v6  ;;  %443 = vmatpush1.msra.mxu0 %v414_v26 }
 0x15f   :  { %v416_v34 = vmul.f32 %v380_v28, %v333_v32  ;;  %v417_v35 = vmul.f32 %v381_v29, %v336_v33 }
 0x161   :  { %v299_v38 = vpop.permute.xlu0 %298  ;;  %513 = vmatprep.subr.mxu1 %v417_v35  ;;  %v314_v39 = vpop.permute.xlu1 %313  ;;  %v358_v35 = vld [vmem:[%s1133_s9 + $0x40] sm:$0xff] }
 0x162   :  { %v321_v40 = vsel %vm319_vm3, %v314_v39, %v316_v30  ;;  %v322_v41 = vsel %vm319_vm3, %v312_v22, %v314_v39  ;;  %514 = vmatpush1.msra.mxu1 %v416_v34 }
 0x163   :  { %v410_v42 = vmul.f32 %v374_v36, %v322_v41  ;;  %v411_v43 = vmul.f32 %v375_v37, %v321_v40  ;;  %v361_v36 = vld [vmem:[%s1133_s9 + $0x58] sm:$0xff]  ;;  %v360_v37 = vld [vmem:[%s1133_s9 + $0x50] sm:$0xff] }
 0x165   :  { %v303_v46 = vpop.permute.xlu0 %302  ;;  %444 = vmatprep.subr.mxu0 %v411_v43  ;;  %v318_v47 = vpop.permute.xlu1 %317 }
 0x166   :  { %v320_v48 = vsel %vm319_vm3, %v316_v30, %v318_v47  ;;  %v323_v49 = vsel %vm319_vm3, %v318_v47, %v312_v22  ;;  %445 = vmatpush1.msra.mxu0 %v410_v42  ;;  %v365_v22 = vld [vmem:[%s1133_s9 + $0x78] sm:$0xff]  ;;  %v359_v30 = vld [vmem:[%s1133_s9 + $0x48] sm:$0xff] }
 0x167   :  { %v412_v50 = vmul.f32 %v376_v44, %v320_v48  ;;  %v413_v51 = vmul.f32 %v377_v45, %v323_v49 }
 0x169   :  { %v286_v57 = vpop.permute.xlu0 %285  ;;  %515 = vmatprep.subr.mxu1 %v413_v51  ;;  %v301_v59 = vpop.permute.xlu1 %300  ;;  %v357_v51 = vld [vmem:[%s1133_s9 + $0x38] sm:$0xff] }
 0x16a   :  { %v308_v60 = vsel %vm306_vm4, %v301_v59, %v303_v46  ;;  %v309_v61 = vsel %vm306_vm4, %v299_v38, %v301_v59  ;;  %516 = vmatpush1.msra.mxu1 %v412_v50  ;;  %v354_v50 = vld [vmem:[%s1133_s9 + $0x20] sm:$0xff] }
 0x16b   :  { %v406_v63 = vmul.f32 %v370_v54, %v309_v61  ;;  %v407_v2 = vmul.f32 %v371_v55, %v308_v60  ;;  %v356_v54 = vld [vmem:[%s1133_s9 + $0x30] sm:$0xff] }
 0x16d   :  { %v290_v6 = vpop.permute.xlu0 %289  ;;  %446 = vmatprep.subr.mxu0 %v407_v2  ;;  %v305_v7 = vpop.permute.xlu1 %304 }
 0x16e   :  { %v307_v9 = vsel %vm306_vm4, %v303_v46, %v305_v7  ;;  %v310_v10 = vsel %vm306_vm4, %v305_v7, %v299_v38  ;;  %447 = vmatpush1.msra.mxu0 %v406_v63  ;;  %v355_v46 = vld [vmem:[%s1133_s9 + $0x28] sm:$0xff] }
 0x16f   :  { %v408_v13 = vmul.f32 %v372_v4, %v307_v9  ;;  %v409_v14 = vmul.f32 %v373_v5, %v310_v10  ;;  %448 = vmatprep.subr.mxu0 %v403_v8  ;;  %v350_v8 = vld [vmem:[%s1133_s9] sm:$0xff]  ;;  %v353_v9 = vld [vmem:[%s1133_s9 + $0x18] sm:$0xff]  ;;  %v352_v10 = vld [vmem:[%s1133_s9 + $0x10] sm:$0xff] }
 0x170   :  { %449 = vmatpush1.msra.mxu0 %v402_v11 }
 0x171   :  { %v273_v16 = vpop.permute.xlu0 %272  ;;  %517 = vmatprep.subr.mxu1 %v409_v14  ;;  %v288_v52 = vpop.permute.xlu1 %287 }
 0x172   :  { %v296_v18 = vsel %vm293_vm5, %v286_v57, %v288_v52  ;;  %518 = vmatpush1.msra.mxu1 %v408_v13  ;;  %v295_v23 = vsel %vm293_vm5, %v288_v52, %v290_v6 }
 0x173   :  { %v399_v20 = vmul.f32 %v363_v15, %v296_v18  ;;  %519 = vmatprep.subr.mxu1 %v405_v17  ;;  %v400_v29 = vmul.f32 %v364_v58, %v295_v23 }
 0x174   :  { %520 = vmatpush1.msra.mxu1 %v404_v19 }
 0x175   :  { %v277_v24 = vpop.permute.xlu0 %276  ;;  %v292_v53 = vpop.permute.xlu1 %291  ;;  %450 = vmatprep.subr.mxu0 %v399_v20 }
 0x176   :  { %v294_v25 = vsel %vm293_vm5, %v290_v6, %v292_v53  ;;  %v297_v26 = vsel %vm293_vm5, %v292_v53, %v286_v57 }
 0x177   :  { %v398_v27 = vmul.f32 %v362_v21, %v297_v26  ;;  %v401_v28 = vmul.f32 %v365_v22, %v294_v25 }
 0x179   :  { %521 = vmatprep.subr.mxu1 %v401_v28  ;;  %v275_v31 = vpop.permute.xlu1 %274  ;;  %451 = vmatpush1.msra.mxu0 %v398_v27  ;;  %v260_v32 = vpop.permute.xlu0 %259 }
 0x17a   :  { %v283_v33 = vsel %vm280_vm6, %v273_v16, %v275_v31  ;;  %522 = vmatpush1.msra.mxu1 %v400_v29  ;;  %v282_v38 = vsel %vm280_vm6, %v275_v31, %v277_v24 }
 0x17b   :  { %v395_v34 = vmul.f32 %v359_v30, %v283_v33  ;;  %v396_v44 = vmul.f32 %v360_v37, %v282_v38 }
 0x17d   :  { %v279_v39 = vpop.permute.xlu1 %278  ;;  %452 = vmatprep.subr.mxu0 %v395_v34  ;;  %v264_v45 = vpop.permute.xlu0 %263 }
 0x17e   :  { %v281_v40 = vsel %vm280_vm6, %v277_v24, %v279_v39  ;;  %v284_v41 = vsel %vm280_vm6, %v279_v39, %v273_v16  ;;  %v422_v16 = vld [vmem:[%s1134_s4] sm:$0xff] }
 0x17f   :  { %v394_v42 = vmul.f32 %v358_v35, %v284_v41  ;;  %v397_v43 = vmul.f32 %v361_v36, %v281_v40 }
 0x181   :  { %523 = vmatprep.subr.mxu1 %v397_v43  ;;  %v262_v47 = vpop.permute.xlu1 %261  ;;  %453 = vmatpush1.msra.mxu0 %v394_v42  ;;  %v245_v59 = vpop.permute.xlu0 %244 }
 0x182   :  { %v270_v48 = vsel %vm267_vm7, %v260_v32, %v262_v47  ;;  %524 = vmatpush1.msra.mxu1 %v396_v44  ;;  %v269_v55 = vsel %vm267_vm7, %v262_v47, %v264_v45 }
 0x183   :  { %v391_v49 = vmul.f32 %v355_v46, %v270_v48  ;;  %v392_v2 = vmul.f32 %v356_v54, %v269_v55 }
 0x185   :  { %v266_v57 = vpop.permute.xlu1 %265  ;;  %454 = vmatprep.subr.mxu0 %v391_v49  ;;  %v249_v7 = vpop.permute.xlu0 %248 }
 0x186   :  { %v268_v60 = vsel %vm267_vm7, %v264_v45, %v266_v57  ;;  %v271_v61 = vsel %vm267_vm7, %v266_v57, %v260_v32  ;;  %v633_v45 = vshrl.u32 %v252_v0, 7 }
 0x187   :  { %v390_v62 = vmul.f32 %v354_v50, %v271_v61  ;;  %v393_v63 = vmul.f32 %v357_v51, %v268_v60  ;;  %v705_v50 = vmov 1966171168  }
 0x188   :  { %v647_v51 = vunpack.c.l.s4 %v705_v50 }
 0x189   :  { %525 = vmatprep.subr.mxu1 %v393_v63  ;;  %v247_v4 = vpop.permute.xlu1 %246  ;;  %455 = vmatpush1.msra.mxu0 %v390_v62 }
 0x18a   :  { %v257_v5 = vsel %vm254_vm8, %v245_v59, %v247_v4  ;;  %526 = vmatpush1.msra.mxu1 %v392_v2  ;;  %v256_v11 = vsel %vm254_vm8, %v247_v4, %v249_v7 }
 0x18b   :  { %v387_v6 = vmul.f32 %v351_v3, %v257_v5  ;;  %v388_v52 = vmul.f32 %v352_v10, %v256_v11  ;;  %v648_v3 = vunpack.c.0.s8 %v647_v51 }
 0x18d   :  { %v251_v12 = vpop.permute.xlu1 %250  ;;  %456 = vmatprep.subr.mxu0 %v387_v6  ;;  %v651_v10 = vsub.s32 %v648_v3, %v633_v45 }
 0x18e   :  { %v255_v13 = vsel %vm254_vm8, %v249_v7, %v251_v12  ;;  %v258_v14 = vsel %vm254_vm8, %v251_v12, %v245_v59  ;;  %v634_v59 = vsub.s32 0, %v633_v45 }
 0x18f   :  { %v386_v56 = vmul.f32 %v350_v8, %v258_v14  ;;  %v389_v15 = vmul.f32 %v353_v9, %v255_v13 }
 0x191   :  { %457 = vmatpush1.msra.mxu0 %v386_v56  ;;  %527 = vmatprep.subr.mxu1 %v389_v15 }
 0x192   :  { %680 = vmatmul.mubr.msk.f32.vlgmr.msra.gmra.mxu0 %vm74_vm0, %v422_v16  ;;  %528 = vmatpush1.msra.mxu1 %v388_v52  ;;  %v572_v17 = vpop.permute.xlu0 %571 }
 0x193   :  { %681 = vmatmul.mubr.msk.f32.vlgmr.msra.gmra.mxu1 %vm74_vm0, %v422_v16 }
 0x196   :  { %v596_v28 = vpop.permute.xlu0 %595 }
 0x19a   :  { %v582_v19 = vpop.permute.xlu1 %581 }
 0x19e   :  { %v630_v63 = vpop.permute.xlu1 %629 }
 0x19f   :  { %v635_v8 = vrot.slane %v630_v63, %v634_v59 }
 0x252   :  { %v492_v18 = vpop.f32.mrf.mxu0 }
 0x253   :  { %v574_v20 = vmul.f32 %v572_v17, %v492_v18  ;;  %v563_v1 = vpop.f32.mrf.mxu1 }
 0x254   :  { %v576_v21 = vmul.f32 %v572_v17, %v563_v1  ;;  %v494_v22 = vpop.f32.mrf.mxu0 }
 0x255   :  { %v584_v58 = vadd.f32 %v582_v19, %v574_v20  ;;  %v575_v23 = vmul.f32 %v572_v17, %v494_v22  ;;  %v565_v24 = vpop.f32.mrf.mxu1 }
 0x256   :  { %v586_v53 = vadd.f32 %v582_v19, %v576_v21  ;;  %v577_v25 = vmul.f32 %v572_v17, %v565_v24 }
 0x257   :  { %v588_v26 = vmax.f32 %v584_v58, 0.0  ;;  %v585_v27 = vadd.f32 %v582_v19, %v575_v23 }
 0x258   :  { %v590_v29 = vmax.f32 %v586_v53, 0.0  ;;  %v587_v30 = vadd.f32 %v582_v19, %v577_v25 }
 0x259   :  { %v598_v31 = vmul.f32 %v596_v28, %v588_v26  ;;  %v589_v32 = vmax.f32 %v585_v27, 0.0 }
 0x25a   :  { %v600_v33 = vmul.f32 %v596_v28, %v590_v29  ;;  %v591_v34 = vmax.f32 %v587_v30, 0.0 }
 0x25b   :  { %v602_v35 = vrot.slane %v598_v31, 4  ;;  %v599_v36 = vmul.f32 %v596_v28, %v589_v32 }
 0x25c   :  { %v614_v37 = vrot.slane %v600_v33, 4  ;;  %v601_v38 = vmul.f32 %v596_v28, %v591_v34 }
 0x25d   :  { %v603_v39 = vadd.f32 %v602_v35, %v598_v31  ;;  %v608_v40 = vrot.slane %v599_v36, 4 }
 0x25e   :  { %v615_v41 = vadd.f32 %v614_v37, %v600_v33  ;;  %v620_v42 = vrot.slane %v601_v38, 4 }
 0x25f   :  { %v604_v43 = vrot.slane %v603_v39, 2  ;;  %v609_v44 = vadd.f32 %v608_v40, %v599_v36 }
 0x260   :  { %v616_v46 = vrot.slane %v615_v41, 2  ;;  %v621_v47 = vadd.f32 %v620_v42, %v601_v38 }
 0x261   :  { %v605_v48 = vadd.f32 %v604_v43, %v603_v39  ;;  %v610_v49 = vrot.slane %v609_v44, 2 }
 0x262   :  { %v617_v54 = vadd.f32 %v616_v46, %v615_v41  ;;  %v622_v55 = vrot.slane %v621_v47, 2 }
 0x263   :  { %v611_v57 = vadd.f32 %v610_v49, %v609_v44  ;;  %v606_v60 = vrot.slane %v605_v48, 1 }
 0x264   :  { %v623_v61 = vadd.f32 %v622_v55, %v621_v47  ;;  %v618_v62 = vrot.slane %v617_v54, 1 }
 0x265   :  { %v612_v2 = vrot.slane %v611_v57, 1  ;;  %v607_v4 = vadd.f32 %v606_v60, %v605_v48 }
 0x266   :  { %v624_v5 = vrot.slane %v623_v61, 1  ;;  %v619_v6 = vadd.f32 %v618_v62, %v617_v54 }
 0x267   :  { %v613_v7 = vadd.f32 %v612_v2, %v611_v57  ;;  %v636_v11 = vadd.f32 %v635_v8, %v607_v4 }
 0x268   :  { %v625_v9 = vadd.f32 %v624_v5, %v623_v61  ;;  %v638_v13 = vadd.f32 %v635_v8, %v619_v6 }
 0x269   :  { %v637_v12 = vadd.f32 %v635_v8, %v613_v7 }
 0x26a   :  { %v639_v14 = vadd.f32 %v635_v8, %v625_v9 }
 0x26b   :  { %v644_v56 = vcombine.low %v636_v11, %v637_v12 }
 0x26c   :  { %v645_v15 = vcombine.low %v638_v13, %v639_v14 }
 0x26d   :  { %v652_v16 = vrot.slane %v644_v56, %v651_v10 }
 0x26e   :  { %v659_v52 = vrot.slane %v645_v15, %v651_v10 }
 0x270   :  { %v660_v17 = vcombine.low %v652_v16, %v659_v52 }
 0x272   :  { %v667_v18 = vrot.slane %v660_v17, %v651_v10 }
 0x274   :  { %673 = vst.msk [vmem:[%s1135_s10] sm:$0xf] %vm671_vm9, %v667_v18 }

</bundles_post_ra>
